<compile_context>
chip_gen: v7x
topology: tpu7x:2x2x1
jax: 0.10.0
libtpu: 0.0.40
codegen_flags: <defaults>
</compile_context>

<pallas_src>
import math
import jax
import jax.numpy as jnp
from jax import lax
from jax.experimental import pallas as pl
from jax.experimental.pallas import tpu as pltpu

LANE = 128
SUBLANE = 8


def _round_up(n, m):
    return ((n + m - 1) // m) * m


def _pad2d(a, rows, cols):
    a = jnp.asarray(a, jnp.float32)
    return jnp.zeros((rows, cols), jnp.float32).at[: a.shape[0], : a.shape[1]].set(a)


def _pad_row(a, n):
    a = jnp.ravel(jnp.asarray(a, jnp.float32))
    return jnp.zeros((n,), jnp.float32).at[: a.shape[0]].set(a)


def noisy_dqn_kernel(x_ref, w1s_ref, w2s_ref, bs_ref, ew1_ref, ew2_ref, eb_ref, o_ref):
    """Fused NoisyLinear(IN->H) -> ReLU -> NoisyLinear(H->A) forward.

    x_ref   : [Bp, INp]    f32  zero-padded input (x.float())
    w1s_ref : [2, INp, H]  f32  static layer-1 stack (w1^T, sigma_w1^T), K-major
    w2s_ref : [2, Ap, H]   f32  static layer-2 stack (w2, sigma_w2), Ap = round_up(A, 8)
    bs_ref  : [2, 2, H]    f32  static bias stack ([b1, b2], [sb1, sb2]), zero-padded
    ew1_ref : [INp, H]     f32  epsilon for layer-1 weights (pre-transposed, padded)
    ew2_ref : [Ap, H]      f32  epsilon for layer-2 weights (row-padded)
    eb_ref  : [2, H]       f32  epsilon for biases ([eb1, eb2]), zero-padded
    o_ref   : [Bp, Ap]     f32  padded output
    """
    x = x_ref[...]

    # Noisy effective weights / biases: one dense elementwise pass each.
    w1 = w1s_ref[0] + w1s_ref[1] * ew1_ref[...]              # [INp, H]
    w2 = w2s_ref[0] + w2s_ref[1] * ew2_ref[...]              # [Ap, H]
    b_eff = bs_ref[0] + bs_ref[1] * eb_ref[...]              # [2, H]

    # Layer 1: x @ w1 -- K on last dim of x / first dim of w1, no transpose.
    h = lax.dot_general(x, w1, (((1,), (0,)), ((), ())),
                        preferred_element_type=jnp.float32)
    h = jnp.maximum(h + b_eff[0:1, :], 0.0)                  # bias + ReLU

    # Layer 2: h @ w2^T over the shared H dim; w2 is a single 8x128 tile, so the
    # implied RHS transpose is one tile through the XLU.
    out = lax.dot_general(h, w2, (((1,), (1,)), ((), ())),
                          preferred_element_type=jnp.float32)
    o_ref[...] = out + b_eff[1:2, : out.shape[1]]


def prepare_static(params):
    """One-time packing of the static (per-training-step) parameters.

    Call this once after parameters change; reuse the result for every forward.
    """
    H, IN = params["w1"].shape
    A = params["w2"].shape[0]
    assert H % LANE == 0, "hidden width must be a multiple of 128"

    INp = _round_up(max(IN, SUBLANE), SUBLANE)   # sublane-aligned K for layer 1
    Ap = _round_up(max(A, SUBLANE), SUBLANE)     # sublane-aligned action dim (8, not 128)

    # Layer 1 pre-transposed to [IN, H]: dense (8,128)-friendly tiles, K-major.
    w1s = jnp.stack([_pad2d(params["w1"].T, INp, H),
                     _pad2d(params["sw1"].T, INp, H)])          # [2, INp, H]
    # Layer 2 kept in PyTorch [A, H] layout, rows zero-padded to Ap = 8.
    w2s = jnp.stack([_pad2d(params["w2"], Ap, H),
                     _pad2d(params["sw2"], Ap, H)])             # [2, Ap, H]
    # Biases / sigmas as [2, 2, H]: leading-axis indexing is free in-kernel.
    bs = jnp.stack([
        jnp.stack([_pad_row(params["b1"], H), _pad_row(params["b2"], H)]),
        jnp.stack([_pad_row(params["sb1"], H), _pad_row(params["sb2"], H)]),
    ])                                                          # [2, 2, H]

    return {"w1s": w1s, "w2s": w2s, "bs": bs, "dims": (IN, H, A, INp, Ap)}


def _pack_noise(noise, dims):
    """Per-forward packing of the (small) epsilon tensors only."""
    IN, H, A, INp, Ap = dims
    ew1 = _pad2d(jnp.asarray(noise["ew1"]).T, INp, H)           # [INp, H]
    ew2 = _pad2d(noise["ew2"], Ap, H)                           # [Ap, H]
    eb = jnp.stack([_pad_row(noise["eb1"], H),
                    _pad_row(noise["eb2"], H)])                 # [2, H]
    return ew1, ew2, eb


def noisy_dqn_forward(x, static_pack, noise):
    """x: [B, IN].  static_pack: output of prepare_static.  noise: eps dict."""
    IN, H, A, INp, Ap = static_pack["dims"]
    B = x.shape[0]
    Bp = _round_up(max(B, SUBLANE), SUBLANE)     # sublane-aligned batch

    # x.float() + zero padding (padded rows/cols contribute nothing we keep).
    x_pad = _pad2d(x, Bp, INp)
    ew1, ew2, eb = _pack_noise(noise, static_pack["dims"])

    args = (x_pad, static_pack["w1s"], static_pack["w2s"], static_pack["bs"],
            ew1, ew2, eb)

    flops = (2 * Bp * INp * H) + (2 * Bp * H * Ap) \
        + 2 * (INp * H + Ap * H + 2 * H) + 2 * Bp * (H + Ap)
    bytes_accessed = sum(int(a.size) * 4 for a in args) + Bp * Ap * 4

    vmem = pl.BlockSpec(memory_space=pltpu.MemorySpace.VMEM)
    out_pad = pl.pallas_call(
        noisy_dqn_kernel,
        out_shape=jax.ShapeDtypeStruct((Bp, Ap), jnp.float32),
        in_specs=[vmem] * len(args),
        out_specs=vmem,
        cost_estimate=pl.CostEstimate(
            flops=flops, transcendentals=0, bytes_accessed=bytes_accessed),
    )(*args)

    return out_pad[:B, :A]


def init_params(key, in_features, hidden, n_actions, sigma_init=0.017):
    """Deterministic parameter init mirroring NoisyLinear.__init__/reset_parameters."""
    k1, k2, k3, k4 = jax.random.split(key, 4)
    std1 = math.sqrt(3.0 / in_features)
    std2 = math.sqrt(3.0 / hidden)
    return {
        "w1": jax.random.uniform(k1, (hidden, in_features), jnp.float32, -std1, std1),
        "b1": jax.random.uniform(k2, (1, hidden), jnp.float32, -std1, std1),
        "sw1": jnp.full((hidden, in_features), sigma_init, jnp.float32),
        "sb1": jnp.full((1, hidden), sigma_init, jnp.float32),
        "w2": jax.random.uniform(k3, (n_actions, hidden), jnp.float32, -std2, std2),
        "b2": jax.random.uniform(k4, (1, n_actions), jnp.float32, -std2, std2),
        "sw2": jnp.full((n_actions, hidden), sigma_init, jnp.float32),
        "sb2": jnp.full((1, n_actions), sigma_init, jnp.float32),
    }


def sample_noise(key, in_features, hidden, n_actions):
    """epsilon_weight.normal_() / epsilon_bias.normal_() — sampled each forward."""
    k1, k2, k3, k4 = jax.random.split(key, 4)
    return {
        "ew1": jax.random.normal(k1, (hidden, in_features), jnp.float32),
        "eb1": jax.random.normal(k2, (1, hidden), jnp.float32),
        "ew2": jax.random.normal(k3, (n_actions, hidden), jnp.float32),
        "eb2": jax.random.normal(k4, (1, n_actions), jnp.float32),
    }


def reference_forward(x, params, noise):
    """Pure-JAX reference mirroring the PyTorch module, for correctness check."""
    x = x.astype(jnp.float32)
    w1 = params["w1"] + params["sw1"] * noise["ew1"]
    b1 = params["b1"] + params["sb1"] * noise["eb1"]
    h = jnp.maximum(x @ w1.T + b1, 0.0)
    w2 = params["w2"] + params["sw2"] * noise["ew2"]
    b2 = params["b2"] + params["sb2"] * noise["eb2"]
    return h @ w2.T + b2


if __name__ == "__main__":
    # Acrobot-v1: observation dim = 6, n_actions = 3; small batch for the demo.
    B, IN_FEATURES, HIDDEN, N_ACTIONS = 2, 6, 128, 3

    key = jax.random.PRNGKey(0)
    k_x, k_p, k_n = jax.random.split(key, 3)

    x = jax.random.normal(k_x, (B, IN_FEATURES), jnp.float32)
    params = init_params(k_p, IN_FEATURES, HIDDEN, N_ACTIONS)
    noise = sample_noise(k_n, IN_FEATURES, HIDDEN, N_ACTIONS)

    # Static packing hoisted out of the per-forward path (done once).
    static_pack = prepare_static(params)

    out = noisy_dqn_forward(x, static_pack, noise)
    out = jax.block_until_ready(out)

    ref = reference_forward(x, params, noise)
    assert out.shape == (B, N_ACTIONS)
    assert jnp.allclose(out, ref, atol=1e-4, rtol=1e-4), (out, ref)

    print("KERNEL_OK")
</pallas_src>

<mosaic_0001>
module attributes {stable_mosaic.version = 11 : i64} {
  func.func @noisy_dqn_kernel(%arg0: memref<8x8xf32, #tpu.memory_space<vmem>>, %arg1: memref<2x8x128xf32, #tpu.memory_space<vmem>>, %arg2: memref<2x8x128xf32, #tpu.memory_space<vmem>>, %arg3: memref<2x2x128xf32, #tpu.memory_space<vmem>>, %arg4: memref<8x128xf32, #tpu.memory_space<vmem>>, %arg5: memref<8x128xf32, #tpu.memory_space<vmem>>, %arg6: memref<2x128xf32, #tpu.memory_space<vmem>>, %arg7: memref<8x8xf32, #tpu.memory_space<vmem>>) attributes {dimension_semantics = [], scalar_prefetch = 0 : i64, scratch_operands = 0 : i64, tpu.core_type = #tpu.core_type<tc>} {
    %c0 = arith.constant 0 : index
    %c0_0 = arith.constant 0 : index
    %0 = vector.load %arg0[%c0, %c0_0] : memref<8x8xf32, #tpu.memory_space<vmem>>, vector<8x8xf32>
    %c0_1 = arith.constant 0 : index
    %c0_2 = arith.constant 0 : index
    %c0_3 = arith.constant 0 : index
    %1 = vector.load %arg1[%c0_1, %c0_2, %c0_3] : memref<2x8x128xf32, #tpu.memory_space<vmem>>, vector<1x8x128xf32>
    %2 = vector.shape_cast %1 : vector<1x8x128xf32> to vector<8x128xf32>
    %c1 = arith.constant 1 : index
    %c0_4 = arith.constant 0 : index
    %c0_5 = arith.constant 0 : index
    %3 = vector.load %arg1[%c1, %c0_4, %c0_5] : memref<2x8x128xf32, #tpu.memory_space<vmem>>, vector<1x8x128xf32>
    %4 = vector.shape_cast %3 : vector<1x8x128xf32> to vector<8x128xf32>
    %c0_6 = arith.constant 0 : index
    %c0_7 = arith.constant 0 : index
    %5 = vector.load %arg4[%c0_6, %c0_7] : memref<8x128xf32, #tpu.memory_space<vmem>>, vector<8x128xf32>
    %6 = arith.mulf %4, %5 : vector<8x128xf32>
    %7 = arith.addf %2, %6 : vector<8x128xf32>
    %c0_8 = arith.constant 0 : index
    %c0_9 = arith.constant 0 : index
    %c0_10 = arith.constant 0 : index
    %8 = vector.load %arg2[%c0_8, %c0_9, %c0_10] : memref<2x8x128xf32, #tpu.memory_space<vmem>>, vector<1x8x128xf32>
    %9 = vector.shape_cast %8 : vector<1x8x128xf32> to vector<8x128xf32>
    %c1_11 = arith.constant 1 : index
    %c0_12 = arith.constant 0 : index
    %c0_13 = arith.constant 0 : index
    %10 = vector.load %arg2[%c1_11, %c0_12, %c0_13] : memref<2x8x128xf32, #tpu.memory_space<vmem>>, vector<1x8x128xf32>
    %11 = vector.shape_cast %10 : vector<1x8x128xf32> to vector<8x128xf32>
    %c0_14 = arith.constant 0 : index
    %c0_15 = arith.constant 0 : index
    %12 = vector.load %arg5[%c0_14, %c0_15] : memref<8x128xf32, #tpu.memory_space<vmem>>, vector<8x128xf32>
    %13 = arith.mulf %11, %12 : vector<8x128xf32>
    %14 = arith.addf %9, %13 : vector<8x128xf32>
    %c0_16 = arith.constant 0 : index
    %c0_17 = arith.constant 0 : index
    %c0_18 = arith.constant 0 : index
    %15 = vector.load %arg3[%c0_16, %c0_17, %c0_18] : memref<2x2x128xf32, #tpu.memory_space<vmem>>, vector<1x2x128xf32>
    %16 = vector.shape_cast %15 : vector<1x2x128xf32> to vector<2x128xf32>
    %c1_19 = arith.constant 1 : index
    %c0_20 = arith.constant 0 : index
    %c0_21 = arith.constant 0 : index
    %17 = vector.load %arg3[%c1_19, %c0_20, %c0_21] : memref<2x2x128xf32, #tpu.memory_space<vmem>>, vector<1x2x128xf32>
    %18 = vector.shape_cast %17 : vector<1x2x128xf32> to vector<2x128xf32>
    %c0_22 = arith.constant 0 : index
    %c0_23 = arith.constant 0 : index
    %19 = vector.load %arg6[%c0_22, %c0_23] : memref<2x128xf32, #tpu.memory_space<vmem>>, vector<2x128xf32>
    %20 = arith.mulf %18, %19 : vector<2x128xf32>
    %21 = arith.addf %16, %20 : vector<2x128xf32>
    %cst = arith.constant dense<0.000000e+00> : vector<8x128xf32>
    %22 = tpu.matmul %0, %7, %cst {dimension_numbers = #tpu.dot_dimension_numbers<[1], [0], [0], [1], [0, 0, 1, 1], [], []>} : vector<8x8xf32>, vector<8x128xf32>, vector<8x128xf32> -> vector<8x128xf32>
    %23 = vector.extract_strided_slice %21 {offsets = [0, 0], sizes = [1, 128], strides = [1, 1]} : vector<2x128xf32> to vector<1x128xf32>
    %24 = vector.broadcast %23 : vector<1x128xf32> to vector<8x128xf32>
    %25 = arith.addf %22, %24 : vector<8x128xf32>
    %cst_24 = arith.constant 0.000000e+00 : f32
    %26 = vector.broadcast %cst_24 : f32 to vector<8x128xf32>
    %27 = arith.maximumf %25, %26 : vector<8x128xf32>
    %cst_25 = arith.constant dense<0.000000e+00> : vector<8x8xf32>
    %28 = tpu.matmul %27, %14, %cst_25 {dimension_numbers = #tpu.dot_dimension_numbers<[1], [1], [0], [0], [0, 0, 1, 0], [], []>} : vector<8x128xf32>, vector<8x128xf32>, vector<8x8xf32> -> vector<8x8xf32>
    %29 = vector.extract_strided_slice %21 {offsets = [1, 0], sizes = [1, 8], strides = [1, 1]} : vector<2x128xf32> to vector<1x8xf32>
    %30 = vector.broadcast %29 : vector<1x8xf32> to vector<8x8xf32>
    %31 = arith.addf %28, %30 : vector<8x8xf32>
    %c0_26 = arith.constant 0 : index
    %c0_27 = arith.constant 0 : index
    %32 = vector.load %arg7[%c0_26, %c0_27] : memref<8x8xf32, #tpu.memory_space<vmem>>, vector<8x8xf32>
    tpu.vector_store %arg7[%c0_26, %c0_27], %31 {strides = array<i32>} : memref<8x8xf32, #tpu.memory_space<vmem>>, vector<8x8xf32>,
    return
  }
}

</mosaic_0001>

<bundles_post_ra>
// kernel: tpu_custom_call.1
= control target key start
LH: loop header
LB: loop body
LE: loop exit
PB: predicated region body
PF: predicated region fallthrough
CT: control target
= control target key end

     0   :  { %12 = vsyncpa [#allocation3], 0  ;;  %s542_s0 = inlined_call_operand.hbm [shape: f32[8,8], index: 0, kind: input, shape index: {}]   ;;  %s543_s1 = inlined_call_operand.hbm [shape: f32[2,8,128], index: 1, kind: input, shape index: {}]   ;;  %s544_s2 = inlined_call_operand.hbm [shape: f32[2,8,128], index: 2, kind: input, shape index: {}]   ;;  %s545_s3 = inlined_call_operand.hbm [shape: f32[2,2,128], index: 3, kind: input, shape index: {}]   ;;  %s546_s4 = inlined_call_operand.vmem [shape: f32[8,128], index: 4, kind: input, shape index: {}]   ;;  %s547_s5 = inlined_call_operand.vmem [shape: f32[8,128], index: 5, kind: input, shape index: {}]   ;;  %s548_s6 = inlined_call_operand.vmem [shape: f32[2,128], index: 6, kind: input, shape index: {}]   ;;  %s549_s7 = inlined_call_operand.hbm [shape: f32[8,8], index: 7, kind: output, shape index: {}]  }
   0x1   :  { %13 = vsyncpa [#allocation6], 0 }
   0x2   :  { %14 = vsyncpa [#allocation9], 0 }
   0x3   :  { %15 = vsyncpa [#allocation4], 0  ;;  %s414_s24 = smov [#allocation5]   ;;  %s296_s28 = scalar_lea.hbm %s543_s1, 256 }
   0x4   :  { %s31_s25 = sshll.u32 %s414_s24, 4  ;;  %p297_p0 = scmp.ne.s32.totalorder %s543_s1, %s296_s28  ;;  %s32_s25 = int_to_ptr.vmem [resolvable:$true] %s31_s25 }
   0x5   :  { %p300_p1 = scmp.lt.u32.totalorder %s296_s28, %s543_s1 }
   0x7   :  { %p302_p2 = pnand %p300_p1, %p297_p0 }
   0x9   :  { %305 = shalt.err (!%p302_p2)
}
   0xa   :  { %s306_s10 = scalar_lea.vmem %s32_s25, 256  ;;  %p311_p4 = scmp.lt.s32.totalorder %s32_s25, %s32_s25 }
   0xb   :  { %p307_p3 = scmp.ne.s32.totalorder %s32_s25, %s306_s10  ;;  %p312_p5 = scmp.lt.s32.totalorder %s306_s10, %s306_s10 }
   0xd   :  { %p313_p6 = por %p312_p5, %p311_p4 }
   0xf   :  { %p314_p7 = pnand %p313_p6, %p307_p3 }
  0x11   :  { %317 = shalt.err (!%p314_p7)
}
  0x12   :  { %s415_s11 = smov 128   ;;  %s416_s12 = smov 8  }
  0x13   :  { %37 = dma.hbm_to_vmem [thread:$0]  %s543_s1, 256, %s32_s25, [#allocation6], %s415_s11, %s415_s11, %s416_s12  }
  0x14   :  { %s417_s15 = smov [#allocation2]   ;;  %s418_s17 = smov [#allocation7]  }
  0x15   :  { %s22_s16 = sshll.u32 %s417_s15, 4  ;;  %s43_s18 = sshll.u32 %s418_s17, 4  ;;  %s23_s16 = int_to_ptr.vmem [resolvable:$true] %s22_s16  ;;  %s44_s18 = int_to_ptr.vmem [resolvable:$true] %s43_s18 }
  0x16   :  { %s318_s21 = scalar_lea.hbm %s542_s0, 128 }
  0x17   :  { %p319_p8 = scmp.ne.s32.totalorder %s542_s0, %s318_s21  ;;  %p322_p9 = scmp.lt.u32.totalorder %s318_s21, %s542_s0 }
  0x19   :  { %p324_p10 = pnand %p322_p9, %p319_p8 }
  0x1b   :  { %327 = shalt.err (!%p324_p10)
}
  0x1c   :  { %s328_s1 = scalar_lea.vmem %s23_s16, 128  ;;  %p333_p12 = scmp.lt.s32.totalorder %s23_s16, %s23_s16 }
  0x1d   :  { %p329_p11 = scmp.ne.s32.totalorder %s23_s16, %s328_s1  ;;  %p334_p13 = scmp.lt.s32.totalorder %s328_s1, %s328_s1 }
  0x1f   :  { %p335_p0 = por %p334_p13, %p333_p12 }
  0x21   :  { %p336_p1 = pnand %p335_p0, %p329_p11 }
  0x23   :  { %339 = shalt.err (!%p336_p1)
}
  0x24   :  { %25 = dma.hbm_to_vmem [thread:$0]  %s542_s0, 128, %s23_s16, [#allocation3]  }
  0x25   :  { %s340_s30 = scalar_lea.hbm %s544_s2, 256 }
  0x26   :  { %p341_p2 = scmp.ne.s32.totalorder %s544_s2, %s340_s30  ;;  %p344_p3 = scmp.lt.u32.totalorder %s340_s30, %s544_s2 }
  0x28   :  { %p346_p4 = pnand %p344_p3, %p341_p2 }
  0x2a   :  { %349 = shalt.err (!%p346_p4)
}
  0x2b   :  { %s350_s14 = scalar_lea.vmem %s44_s18, 256  ;;  %p355_p6 = scmp.lt.s32.totalorder %s44_s18, %s44_s18 }
  0x2c   :  { %p351_p5 = scmp.ne.s32.totalorder %s44_s18, %s350_s14  ;;  %p356_p7 = scmp.lt.s32.totalorder %s350_s14, %s350_s14 }
  0x2e   :  { %p357_p8 = por %p356_p7, %p355_p6 }
  0x30   :  { %p358_p9 = pnand %p357_p8, %p351_p5 }
  0x32   :  { %361 = shalt.err (!%p358_p9)
}
  0x33   :  { %49 = dma.hbm_to_vmem [thread:$0]  %s544_s2, 256, %s44_s18, [#allocation6], %s415_s11, %s415_s11, %s416_s12  }
  0x34   :  { %s419_s16 = smov [#allocation8]   ;;  %s362_s21 = scalar_lea.hbm %s545_s3, 64 }
  0x35   :  { %s55_s17 = sshll.u32 %s419_s16, 4  ;;  %p363_p10 = scmp.ne.s32.totalorder %s545_s3, %s362_s21  ;;  %s56_s17 = int_to_ptr.vmem [resolvable:$true] %s55_s17 }
  0x36   :  { %p366_p11 = scmp.lt.u32.totalorder %s362_s21, %s545_s3 }
  0x38   :  { %p368_p12 = pnand %p366_p11, %p363_p10 }
  0x3a   :  { %371 = shalt.err (!%p368_p12)
}
  0x3b   :  { %s372_s1 = scalar_lea.vmem %s56_s17, 64  ;;  %p377_p0 = scmp.lt.s32.totalorder %s56_s17, %s56_s17 }
  0x3c   :  { %p373_p13 = scmp.ne.s32.totalorder %s56_s17, %s372_s1  ;;  %p378_p1 = scmp.lt.s32.totalorder %s372_s1, %s372_s1 }
  0x3e   :  { %p379_p2 = por %p378_p1, %p377_p0 }
  0x40   :  { %p380_p3 = pnand %p379_p2, %p373_p13 }
  0x42   :  { %383 = shalt.err (!%p380_p3)
}
  0x43   :  { %s420_s2 = smov 32   ;;  %s421_s11 = smov 2  }
  0x44   :  { %61 = dma.hbm_to_vmem [thread:$0]  %s545_s3, 64, %s56_s17, [#allocation9], %s420_s2, %s420_s2, %s421_s11  }
  0x45   :  { %406 = dma.done.wait [#allocation3], 128  }
  0x46   :  { %407 = vsyncadd [#allocation3], 4294967168 }
  0x47   :  { %408 = dma.done.wait [#allocation6], 512  }
  0x48   :  { %409 = vsyncadd [#allocation6], 4294966784 }
  0x49   :  { %410 = dma.done.wait [#allocation9], 64  }
  0x4a   :  { %411 = vsyncadd [#allocation9], 4294967232  ;;  %v422_v0 = vmov 0.0   ;;  %vm423_vm0 = vmmov 0   ;;  %v81_v1 = vld [vmem:[#allocation5] sm:$0xff]  ;;  %v83_v2 = vld [vmem:[#allocation5 + $0x8] sm:$0xff]  ;;  %v99_v12 = vlaneseq }
  0x4b   :  { %275 = vmatprep.subr.mxu0 %v422_v0  ;;  %277 = vmatprep.mubr.msk.f32.mxu0 %vm423_vm0, %v422_v0  ;;  %v84_v3 = vld [vmem:[%s546_s4] sm:$0xff]  ;;  %vm103_vm1 = vcmask 64512   ;;  %v87_v10 = vld [vmem:[#allocation7] sm:$0xff]  ;;  %v95_v13 = vld [vmem:[#allocation8 + $0x2] sm:$0x3] }
  0x4c   :  { %280 = vmatprep.subr.mxu1 %v422_v0  ;;  %282 = vmatprep.mubr.msk.f32.mxu1 %vm423_vm0, %v422_v0  ;;  %v85_v4 = vmul.f32 %v84_v3, %v83_v2  ;;  %v80_v6 = vld [vmem:[#allocation2] sm:$0xff]  ;;  %v100_v16 = vshrl.u32 %v99_v12, 7  ;;  %v93_v17 = vld [vmem:[#allocation8] sm:$0x3] }
  0x4d   :  { %v89_v7 = vld [vmem:[#allocation7 + $0x8] sm:$0xff] }
  0x4e   :  { %v86_v5 = vadd.f32 %v85_v4, %v81_v1  ;;  %v90_v8 = vld [vmem:[%s547_s5] sm:$0xff]  ;;  %v101_v19 = vsub.s32 0, %v100_v16  ;;  %v180_v25 = vsub.s32 1, %v100_v16  ;;  %s424_s5 = smov [#allocation10]  }
  0x4f   :  { %v91_v9 = vmul.f32 %v90_v8, %v89_v7  ;;  %v96_v14 = vld [vmem:[%s548_s6] sm:$0x3]  ;;  %s259_s30 = sshll.u32 %s424_s5, 4  ;;  %s260_s30 = int_to_ptr.vmem [resolvable:$true] %s259_s30 }
  0x50   :  { %276 = vmatpush3.msra.mxu0 %v86_v5  ;;  %v97_v15 = vmul.f32 %v96_v14, %v95_v13  ;;  %s384_s6 = scalar_lea.vmem %s260_s30, 128  ;;  %p389_p5 = scmp.lt.s32.totalorder %s260_s30, %s260_s30 }
  0x51   :  { %278 = vmatmul.mubr.msk.f32.vlgmr.msra.gmra.mrb[0].mxu0 %vm103_vm1, %v80_v6  ;;  %v92_v11 = vadd.f32 %v91_v9, %v87_v10  ;;  %p385_p4 = scmp.ne.s32.totalorder %s260_s30, %s384_s6  ;;  %p390_p6 = scmp.lt.s32.totalorder %s384_s6, %s384_s6 }
  0x52   :  { %v98_v18 = vadd.f32 %v97_v15, %v93_v17 }
  0x53   :  { %281 = vmatpush3.xpose.msra.mxu1 %v92_v11  ;;  %p391_p7 = por %p390_p6, %p389_p5 }
  0x54   :  { %v102_v20 = vrot.slane %v98_v18, %v101_v19  ;;  %v181_v26 = vrot.slane %v98_v18, %v180_v25 }
  0x55   :  { %p392_p8 = pnand %p391_p7, %p385_p4 }
 0x124   :  { %v173_v21 = vpop.f32.mrb[0].mxu0 }
 0x125   :  { %v174_v22 = vadd.f32 %v173_v21, %v102_v20  ;;  %v279_v23 = vpop.f32.mrb[1].mxu0 }
 0x127   :  { %v177_v24 = vmax.f32 %v174_v22, 0.0 }
 0x129   :  { %283 = vmatmul.mubr.f32.vlgmr.msra.gmra.mrb[0].mxu1 %v177_v24 }
 0x1fc   :  { %v248_v27 = vpop.f32.mrb[0].mxu1 }
 0x1fd   :  { %v249_v28 = vadd.f32 %v248_v27, %v181_v26  ;;  %v284_v29 = vpop.f32.mrb[1].mxu1 }
 0x1ff   :  { %252 = vst.msk [vmem:[#allocation10] sm:$0xff] %vm103_vm1, %v249_v28 }
 0x200   :  { %395 = shalt.err (!%p392_p8)
}
 0x201   :  { %s396_s10 = scalar_lea.hbm %s549_s7, 128 }
 0x202   :  { %p397_p9 = scmp.ne.s32.totalorder %s549_s7, %s396_s10  ;;  %p400_p10 = scmp.lt.u32.totalorder %s396_s10, %s549_s7 }
 0x204   :  { %p402_p11 = pnand %p400_p10, %p397_p9 }
 0x206   :  { %405 = shalt.err (!%p402_p11)
}
 0x207   :  { %262 = dma.vmem_to_hbm [thread:$0]  %s260_s30, 128, %s549_s7, [#allocation4]  }
 0x208   :  { %412 = dma.done.wait [#allocation4], 128  }
 0x209   :  { %413 = vsyncadd [#allocation4], 4294967168 }
 0x20a   :  { %266 = vsyncpa [#allocation3], 1 }
 0x20b   :  { %267 = vsyncpa [#allocation6], 1 }
 0x20c   :  { %268 = vsyncpa [#allocation9], 1 }
 0x20d   :  { %269 = vsyncpa [#allocation4], 1 }

</bundles_post_ra>
